<compile_context>
chip_gen: v5e
topology: v5e:2x2
jax: 0.10.0
libtpu: 0.0.40
codegen_flags: <defaults>
</compile_context>

<pallas_src>
import jax
import jax.numpy as jnp
from jax.experimental import pallas as pl
from jax.experimental.pallas import tpu as pltpu


def _round_up(x, m):
    return (x + m - 1) // m * m


def _pick_tile(d128):
    """Largest tile <= 2048 that is a multiple of 128 and divides d128."""
    n = d128 // 128
    for cand in range(min(n, 16), 0, -1):
        if n % cand == 0:
            return cand * 128
    return 128


def _similarity_kernel(fs_ref, ft_ref, out_ref, gs_acc, gt_acc):
    k = pl.program_id(0)

    @pl.when(k == 0)
    def _init():
        gs_acc[...] = jnp.zeros_like(gs_acc)
        gt_acc[...] = jnp.zeros_like(gt_acc)

    # Gram contributions of this D-chunk: (B, TD) @ (B, TD)^T  -> (B, B).
    # Contract on the feature axis; accumulate in f32 on the MXU.
    dn = (((1,), (1,)), ((), ()))
    fs = fs_ref[...]
    ft = ft_ref[...]
    gs_acc[...] += jax.lax.dot_general(fs, fs, dn,
                                       preferred_element_type=jnp.float32)
    gt_acc[...] += jax.lax.dot_general(ft, ft, dn,
                                       preferred_element_type=jnp.float32)

    @pl.when(k == pl.num_programs(0) - 1)
    def _finalize():
        g_s = gs_acc[...]
        g_t = gt_acc[...]
        # torch.nn.functional.normalize(G): x / max(||row||_2, 1e-12)
        # == x * rsqrt(max(sum(x^2), 1e-24)); rsqrt runs on the EUP slot.
        eps2 = jnp.float32(1e-24)
        inv_ns = jax.lax.rsqrt(
            jnp.maximum(jnp.sum(g_s * g_s, axis=1, keepdims=True), eps2))
        inv_nt = jnp.maximum(jnp.sum(g_t * g_t, axis=1, keepdims=True), eps2)
        inv_nt = jax.lax.rsqrt(inv_nt)
        diff = g_t * inv_nt - g_s * inv_ns
        bsz = g_s.shape[0]
        out_ref[0, 0] = jnp.sum(diff * diff) / jnp.float32(bsz * bsz)


def similarity_loss(g_s, g_t):
    """Pallas implementation of Similarity.forward(g_s, g_t)."""
    bsz = g_s.shape[0]
    f_s = g_s.reshape(bsz, -1)          # keep native dtype (bf16 stays bf16)
    f_t = g_t.reshape(bsz, -1)
    assert f_s.shape == f_t.shape, "student/teacher must flatten to same (B, D)"
    d = f_s.shape[1]

    # Lane constraint: the D-tile must be a multiple of 128.  Pad (zeros do
    # not change f @ f.T) only when D itself is not 128-aligned.
    d128 = _round_up(d, 128)
    if d128 != d:
        f_s = jnp.pad(f_s, ((0, 0), (0, d128 - d)))
        f_t = jnp.pad(f_t, ((0, 0), (0, d128 - d)))
    td = _pick_tile(d128)
    num_k = d128 // td

    itemsize = jnp.dtype(f_s.dtype).itemsize
    cost = pl.CostEstimate(
        flops=4 * bsz * bsz * d128,               # two B x B x D matmuls
        transcendentals=2 * bsz,                  # row rsqrt, both Grams
        bytes_accessed=2 * bsz * d128 * itemsize + 4,
    )

    out = pl.pallas_call(
        _similarity_kernel,
        out_shape=jax.ShapeDtypeStruct((1, 1), jnp.float32),
        grid=(num_k,),
        in_specs=[
            pl.BlockSpec((bsz, td), lambda k: (0, k)),
            pl.BlockSpec((bsz, td), lambda k: (0, k)),
        ],
        out_specs=pl.BlockSpec(memory_space=pltpu.MemorySpace.SMEM),
        scratch_shapes=[
            pltpu.VMEM((bsz, bsz), jnp.float32),   # G_s accumulator
            pltpu.VMEM((bsz, bsz), jnp.float32),   # G_t accumulator
        ],
        compiler_params=pltpu.CompilerParams(
            dimension_semantics=("arbitrary",)),   # reduction axis
        cost_estimate=cost,
    )(f_s, f_t)
    # matches torch: (G_diff*G_diff).view(-1,1).sum(0) -> shape (1,)
    return out.reshape(1)


def _similarity_loss_ref(g_s, g_t):
    """Pure-JAX reference mirroring the PyTorch module."""
    bsz = g_s.shape[0]
    f_s = g_s.reshape(bsz, -1).astype(jnp.float32)
    f_t = g_t.reshape(bsz, -1).astype(jnp.float32)
    G_s = f_s @ f_s.T
    G_t = f_t @ f_t.T
    eps = 1e-12
    G_s = G_s / jnp.maximum(jnp.linalg.norm(G_s, axis=1, keepdims=True), eps)
    G_t = G_t / jnp.maximum(jnp.linalg.norm(G_t, axis=1, keepdims=True), eps)
    dd = G_t - G_s
    return (jnp.sum(dd * dd) / (bsz * bsz)).reshape(1)


if __name__ == "__main__":
    key = jax.random.PRNGKey(0)
    k1, k2, k3, k4 = jax.random.split(key, 4)

    # Case 1: original small NCHW activations (D = 1024 -> single grid step).
    g_s1 = jax.random.normal(k1, (2, 4, 16, 16), dtype=jnp.float32)
    g_t1 = jax.random.normal(k2, (2, 4, 16, 16), dtype=jnp.float32)
    loss1 = jax.block_until_ready(similarity_loss(g_s1, g_t1))
    ref1 = jax.block_until_ready(_similarity_loss_ref(g_s1, g_t1))
    assert loss1.shape == (1,)
    assert jnp.allclose(loss1, ref1, rtol=1e-4, atol=1e-6), (loss1, ref1)

    # Case 2: D = 4096 -> tile 2048, two grid steps (exercises accumulation).
    g_s2 = jax.random.normal(k3, (4, 16, 16, 16), dtype=jnp.float32)
    g_t2 = jax.random.normal(k4, (4, 16, 16, 16), dtype=jnp.float32)
    loss2 = jax.block_until_ready(similarity_loss(g_s2, g_t2))
    ref2 = jax.block_until_ready(_similarity_loss_ref(g_s2, g_t2))
    assert loss2.shape == (1,)
    assert jnp.allclose(loss2, ref2, rtol=1e-4, atol=1e-6), (loss2, ref2)

    print("KERNEL_OK")
</pallas_src>

<mosaic_0001>
module attributes {stable_mosaic.version = 11 : i64} {
  func.func @_similarity_kernel(%arg0: i32, %arg1: memref<2x1024xf32, #tpu.memory_space<vmem>>, %arg2: memref<2x1024xf32, #tpu.memory_space<vmem>>, %arg3: memref<1x1xf32, #tpu.memory_space<smem>>, %arg4: memref<2x2xf32, #tpu.memory_space<vmem>>, %arg5: memref<2x2xf32, #tpu.memory_space<vmem>>) attributes {dimension_semantics = [#tpu.dimension_semantics<arbitrary>], iteration_bounds = array<i64: 1>, scalar_prefetch = 0 : i64, scratch_operands = 2 : i64, tpu.core_type = #tpu.core_type<tc>, window_params = [{transform_indices = @transform_0, window_bounds = array<i64: 2, 1024>}, {transform_indices = @transform_1, window_bounds = array<i64: 2, 1024>}, {transform_indices = @transform_2, window_bounds = array<i64: 1, 1>}]} {
    %c0_i32 = arith.constant 0 : i32
    %0 = arith.cmpi eq, %arg0, %c0_i32 : i32
    %1 = arith.extui %0 : i1 to i32
    %c0_i32_0 = arith.constant 0 : i32
    %2 = arith.cmpi ne, %1, %c0_i32_0 : i32
    scf.if %2 {
      %cst_15 = arith.constant 0.000000e+00 : f32
      %16 = vector.broadcast %cst_15 : f32 to vector<2x2xf32>
      %c0_16 = arith.constant 0 : index
      %c0_17 = arith.constant 0 : index
      %17 = vector.load %arg4[%c0_16, %c0_17] : memref<2x2xf32, #tpu.memory_space<vmem>>, vector<2x2xf32>
      tpu.vector_store %arg4[%c0_16, %c0_17], %16 {strides = array<i32>} : memref<2x2xf32, #tpu.memory_space<vmem>>, vector<2x2xf32>,
      %cst_18 = arith.constant 0.000000e+00 : f32
      %18 = vector.broadcast %cst_18 : f32 to vector<2x2xf32>
      %c0_19 = arith.constant 0 : index
      %c0_20 = arith.constant 0 : index
      %19 = vector.load %arg5[%c0_19, %c0_20] : memref<2x2xf32, #tpu.memory_space<vmem>>, vector<2x2xf32>
      tpu.vector_store %arg5[%c0_19, %c0_20], %18 {strides = array<i32>} : memref<2x2xf32, #tpu.memory_space<vmem>>, vector<2x2xf32>,
    } else {
    }
    %c0 = arith.constant 0 : index
    %c0_1 = arith.constant 0 : index
    %3 = vector.load %arg1[%c0, %c0_1] : memref<2x1024xf32, #tpu.memory_space<vmem>>, vector<2x1024xf32>
    %c0_2 = arith.constant 0 : index
    %c0_3 = arith.constant 0 : index
    %4 = vector.load %arg2[%c0_2, %c0_3] : memref<2x1024xf32, #tpu.memory_space<vmem>>, vector<2x1024xf32>
    %c0_4 = arith.constant 0 : index
    %c0_5 = arith.constant 0 : index
    %5 = vector.load %arg4[%c0_4, %c0_5] : memref<2x2xf32, #tpu.memory_space<vmem>>, vector<2x2xf32>
    %cst = arith.constant dense<0.000000e+00> : vector<2x2xf32>
    %6 = tpu.matmul %3, %3, %cst {dimension_numbers = #tpu.dot_dimension_numbers<[1], [1], [0], [0], [0, 0, 1, 0], [], []>} : vector<2x1024xf32>, vector<2x1024xf32>, vector<2x2xf32> -> vector<2x2xf32>
    %7 = arith.addf %5, %6 : vector<2x2xf32>
    %c0_6 = arith.constant 0 : index
    %c0_7 = arith.constant 0 : index
    %8 = vector.load %arg4[%c0_6, %c0_7] : memref<2x2xf32, #tpu.memory_space<vmem>>, vector<2x2xf32>
    tpu.vector_store %arg4[%c0_6, %c0_7], %7 {strides = array<i32>} : memref<2x2xf32, #tpu.memory_space<vmem>>, vector<2x2xf32>,
    %c0_8 = arith.constant 0 : index
    %c0_9 = arith.constant 0 : index
    %9 = vector.load %arg5[%c0_8, %c0_9] : memref<2x2xf32, #tpu.memory_space<vmem>>, vector<2x2xf32>
    %cst_10 = arith.constant dense<0.000000e+00> : vector<2x2xf32>
    %10 = tpu.matmul %4, %4, %cst_10 {dimension_numbers = #tpu.dot_dimension_numbers<[1], [1], [0], [0], [0, 0, 1, 0], [], []>} : vector<2x1024xf32>, vector<2x1024xf32>, vector<2x2xf32> -> vector<2x2xf32>
    %11 = arith.addf %9, %10 : vector<2x2xf32>
    %c0_11 = arith.constant 0 : index
    %c0_12 = arith.constant 0 : index
    %12 = vector.load %arg5[%c0_11, %c0_12] : memref<2x2xf32, #tpu.memory_space<vmem>>, vector<2x2xf32>
    tpu.vector_store %arg5[%c0_11, %c0_12], %11 {strides = array<i32>} : memref<2x2xf32, #tpu.memory_space<vmem>>, vector<2x2xf32>,
    %c0_i32_13 = arith.constant 0 : i32
    %13 = arith.cmpi eq, %arg0, %c0_i32_13 : i32
    %14 = arith.extui %13 : i1 to i32
    %c0_i32_14 = arith.constant 0 : i32
    %15 = arith.cmpi ne, %14, %c0_i32_14 : i32
    scf.if %15 {
      %c0_15 = arith.constant 0 : index
      %c0_16 = arith.constant 0 : index
      %16 = vector.load %arg4[%c0_15, %c0_16] : memref<2x2xf32, #tpu.memory_space<vmem>>, vector<2x2xf32>
      %c0_17 = arith.constant 0 : index
      %c0_18 = arith.constant 0 : index
      %17 = vector.load %arg5[%c0_17, %c0_18] : memref<2x2xf32, #tpu.memory_space<vmem>>, vector<2x2xf32>
      %18 = arith.mulf %16, %16 : vector<2x2xf32>
      %cst_19 = arith.constant dense<0.000000e+00> : vector<2xf32>
      %19 = vector.multi_reduction <add>, %18, %cst_19 [1] : vector<2x2xf32> to vector<2xf32>
      %20 = vector.shape_cast %19 : vector<2xf32> to vector<2x1xf32>
      %cst_20 = arith.constant 1.000000e-24 : f32
      %21 = vector.broadcast %cst_20 : f32 to vector<2x1xf32>
      %22 = arith.maximumf %20, %21 : vector<2x1xf32>
      %23 = math.rsqrt %22 : vector<2x1xf32>
      %24 = arith.mulf %17, %17 : vector<2x2xf32>
      %cst_21 = arith.constant dense<0.000000e+00> : vector<2xf32>
      %25 = vector.multi_reduction <add>, %24, %cst_21 [1] : vector<2x2xf32> to vector<2xf32>
      %26 = vector.shape_cast %25 : vector<2xf32> to vector<2x1xf32>
      %cst_22 = arith.constant 1.000000e-24 : f32
      %27 = vector.broadcast %cst_22 : f32 to vector<2x1xf32>
      %28 = arith.maximumf %26, %27 : vector<2x1xf32>
      %29 = math.rsqrt %28 : vector<2x1xf32>
      %30 = vector.broadcast %29 : vector<2x1xf32> to vector<2x2xf32>
      %31 = arith.mulf %17, %30 : vector<2x2xf32>
      %32 = vector.broadcast %23 : vector<2x1xf32> to vector<2x2xf32>
      %33 = arith.mulf %16, %32 : vector<2x2xf32>
      %34 = arith.subf %31, %33 : vector<2x2xf32>
      %35 = arith.mulf %34, %34 : vector<2x2xf32>
      %36 = vector.shape_cast %35 : vector<2x2xf32> to vector<1x2x2xf32>
      %cst_23 = arith.constant dense<0.000000e+00> : vector<1xf32>
      %37 = vector.multi_reduction <add>, %36, %cst_23 [1, 2] : vector<1x2x2xf32> to vector<1xf32>
      %38 = vector.shape_cast %37 : vector<1xf32> to vector<1x1x1xf32>
      %39 = vector.extract %38[0, 0, 0] : f32 from vector<1x1x1xf32>
      %cst_24 = arith.constant 4.000000e+00 : f32
      %40 = arith.divf %39, %cst_24 : f32
      %c0_25 = arith.constant 0 : index
      %c0_26 = arith.constant 0 : index
      %41 = memref.load %arg3[%c0_25, %c0_26] : memref<1x1xf32, #tpu.memory_space<smem>>
      memref.store %40, %arg3[%c0_25, %c0_26] : memref<1x1xf32, #tpu.memory_space<smem>>
    } else {
    }
    return
  }
  func.func @transform_0(%arg0: i32) -> (i32, i32) {
    %c0_i32 = arith.constant 0 : i32
    %c0_i32_0 = arith.constant 0 : i32
    return %c0_i32, %arg0 : i32, i32
  }
  func.func @transform_1(%arg0: i32) -> (i32, i32) {
    %c0_i32 = arith.constant 0 : i32
    %c0_i32_0 = arith.constant 0 : i32
    return %c0_i32, %arg0 : i32, i32
  }
  func.func @transform_2(%arg0: i32) -> (i32, i32) {
    %c0_i32 = arith.constant 0 : i32
    %c0_i32_0 = arith.constant 0 : i32
    %c0_i32_1 = arith.constant 0 : i32
    return %c0_i32, %c0_i32_0 : i32, i32
  }
}

</mosaic_0001>

<bundles_post_ra>
// kernel: tpu_custom_call.1
= control target key start
LH: loop header
LB: loop body
LE: loop exit
PB: predicated region body
PF: predicated region fallthrough
CT: control target
= control target key end

     0   :  { %7 = vsyncpa [#allocation5], 0  ;;  %s652_s0 = inlined_call_operand.hbm [shape: f32[2,1024], index: 0, kind: input, shape index: {}]   ;;  %s653_s1 = inlined_call_operand.hbm [shape: f32[2,1024], index: 1, kind: input, shape index: {}]   ;;  %s654_s2 = inlined_call_operand.hbm [shape: f32[1,1], index: 2, kind: output, shape index: {}]  }
   0x1   :  { %8 = vsyncpa [#allocation8], 0 }
   0x2   :  { %9 = vsyncpa [#allocation6], 0  ;;  %s15_s11 = sshll.u32 %s652_s0, 4  ;;  %s616_s12 = smov [#allocation4]   ;;  %s16_s11 = int_to_ptr.hbm [resolvable:$true] %s15_s11 }
   0x3   :  { %s17_s13 = sshll.u32 %s616_s12, 4  ;;  %s26_s16 = sshll.u32 %s653_s1, 4  ;;  %s18_s13 = int_to_ptr.vmem [resolvable:$true] %s17_s13  ;;  %s27_s16 = int_to_ptr.hbm [resolvable:$true] %s26_s16 }
   0x4   :  { %20 = dma.hbm_to_vmem [thread:$0]  %s16_s11, 256, %s18_s13, [#allocation5]  }
   0x5   :  { %s617_s17 = smov [#allocation7]  }
   0x6   :  { %s28_s18 = sshll.u32 %s617_s17, 4  ;;  %s29_s18 = int_to_ptr.vmem [resolvable:$true] %s28_s18 }
   0x7   :  { %31 = dma.hbm_to_vmem [thread:$0]  %s27_s16, 256, %s29_s18, [#allocation8]  }
   0x8   :  { %610 = dma.done.wait [#allocation5], 256  }
   0x9   :  { %611 = vsyncadd [#allocation5], 4294967040 }
   0xa   :  { %612 = dma.done.wait [#allocation8], 256  }
   0xb   :  { %613 = vsyncadd [#allocation8], 4294967040  ;;  %v47_v0 = vld [vmem:[#allocation4] sm:$0xff]  ;;  %v48_v1 = vld [vmem:[#allocation4 + $0x8] sm:$0xff]  ;;  %vm44_vm0 = vcmask 9216   ;;  %v618_v36 = vmov 0.0  }
   0xc   :  { %54 = vst [vmem:[#allocation1] ss:$4 sm:$0xff] %v47_v0  ;;  %v49_v10 = vld [vmem:[#allocation7] sm:$0xff]  ;;  %v50_v15 = vld [vmem:[#allocation7 + $0x8] sm:$0xff]  ;;  %s523_s19 = sshll.u32 %s654_s2, 4  ;;  %s620_s23 = smov [#allocation9]   ;;  %s524_s19 = int_to_ptr.hbm [resolvable:$true] %s523_s19 }
   0xd   :  { %56 = vst [vmem:[#allocation1 + $0x20] ss:$4 sm:$0xff] %v48_v1 }
   0xe   :  { %45 = vst.msk [vmem:[#allocation2] sm:$0x3] %vm44_vm0, %v618_v36 }
   0xf   :  { %46 = vst.msk [vmem:[#allocation3] sm:$0x3] %vm44_vm0, %v618_v36  ;;  %v619_v36 = vmov 4.0  }
  0x13   :  { %v57_v2 = vld.sshfl [vmem:[#allocation1] sm:$0xff pattern:$0x73625140]  ;;  %v58_v3 = vld.sshfl [vmem:[#allocation1 + $0x8] sm:$0xff pattern:$0x73625140] }
  0x14   :  { %v59_v4 = vld.sshfl [vmem:[#allocation1 + $0x10] sm:$0xff pattern:$0x73625140]  ;;  %v60_v5 = vld.sshfl [vmem:[#allocation1 + $0x18] sm:$0xff pattern:$0x73625140] }
  0x15   :  { %73 = vst [vmem:[#allocation1] ss:$4 sm:$0xff] %v47_v0  ;;  %v61_v6 = vld.sshfl [vmem:[#allocation1 + $0x20] sm:$0xff pattern:$0x73625140] }
  0x16   :  { %v62_v7 = vld.sshfl [vmem:[#allocation1 + $0x28] sm:$0xff pattern:$0x73625140]  ;;  %v63_v8 = vld.sshfl [vmem:[#allocation1 + $0x30] sm:$0xff pattern:$0x73625140] }
  0x17   :  { %v64_v9 = vld.sshfl [vmem:[#allocation1 + $0x38] sm:$0xff pattern:$0x73625140]  ;;  %v51_v51 = vld [vmem:[#allocation2] sm:$0x3] }
  0x18   :  { %75 = vst [vmem:[#allocation1 + $0x20] ss:$4 sm:$0xff] %v48_v1 }
  0x1c   :  { %v78_v11 = vld.sshfl [vmem:[#allocation1 + $0x10] sm:$0xff pattern:$0x73625140]  ;;  %v76_v12 = vld.sshfl [vmem:[#allocation1] sm:$0xff pattern:$0x73625140] }
  0x1d   :  { %147 = vmatpush.xpose.msra.mxu2 %v78_v11  ;;  %107 = vmatpush.xpose.msra.mxu0 %v76_v12  ;;  %v79_v13 = vld.sshfl [vmem:[#allocation1 + $0x18] sm:$0xff pattern:$0x73625140]  ;;  %v77_v14 = vld.sshfl [vmem:[#allocation1 + $0x8] sm:$0xff pattern:$0x73625140] }
  0x1e   :  { %167 = vmatpush.xpose.msra.mxu3 %v79_v13  ;;  %127 = vmatpush.xpose.msra.mxu1 %v77_v14  ;;  %258 = vst [vmem:[#allocation1] ss:$4 sm:$0xff] %v49_v10 }
  0x1f   :  { %v82_v16 = vld.sshfl [vmem:[#allocation1 + $0x30] sm:$0xff pattern:$0x73625140]  ;;  %v80_v17 = vld.sshfl [vmem:[#allocation1 + $0x20] sm:$0xff pattern:$0x73625140] }
  0x20   :  { %148 = vmatmul.f32.vlgmr.msra.gmra.mxu2 %v59_v4  ;;  %108 = vmatmul.f32.vlgmr.msra.gmra.mxu0 %v57_v2  ;;  %v83_v18 = vld.sshfl [vmem:[#allocation1 + $0x38] sm:$0xff pattern:$0x73625140]  ;;  %v81_v19 = vld.sshfl [vmem:[#allocation1 + $0x28] sm:$0xff pattern:$0x73625140] }
  0x21   :  { %168 = vmatmul.f32.vlgmr.msra.gmra.mxu3 %v60_v5  ;;  %128 = vmatmul.f32.vlgmr.msra.gmra.mxu1 %v58_v3  ;;  %260 = vst [vmem:[#allocation1 + $0x20] ss:$4 sm:$0xff] %v50_v15 }
  0x22   :  { %227 = vmatpush.xpose.msrb.mxu2 %v82_v16  ;;  %187 = vmatpush.xpose.msrb.mxu0 %v80_v17 }
  0x23   :  { %247 = vmatpush.xpose.msrb.mxu3 %v83_v18  ;;  %207 = vmatpush.xpose.msrb.mxu1 %v81_v19 }
  0x25   :  { %v261_v20 = vld.sshfl [vmem:[#allocation1] sm:$0xff pattern:$0x73625140]  ;;  %v262_v21 = vld.sshfl [vmem:[#allocation1 + $0x8] sm:$0xff pattern:$0x73625140] }
  0x26   :  { %v263_v22 = vld.sshfl [vmem:[#allocation1 + $0x10] sm:$0xff pattern:$0x73625140]  ;;  %v264_v23 = vld.sshfl [vmem:[#allocation1 + $0x18] sm:$0xff pattern:$0x73625140] }
  0x27   :  { %277 = vst [vmem:[#allocation1] ss:$4 sm:$0xff] %v49_v10 }
  0x28   :  { %228 = vmatmul.f32.vlgmr.msrb.gmra.mxu2 %v63_v8  ;;  %v265_v24 = vld.sshfl [vmem:[#allocation1 + $0x20] sm:$0xff pattern:$0x73625140]  ;;  %v266_v25 = vld.sshfl [vmem:[#allocation1 + $0x28] sm:$0xff pattern:$0x73625140]  ;;  %188 = vmatmul.f32.vlgmr.msrb.gmra.mxu0 %v61_v6 }
  0x29   :  { %v267_v26 = vld.sshfl [vmem:[#allocation1 + $0x30] sm:$0xff pattern:$0x73625140]  ;;  %v268_v27 = vld.sshfl [vmem:[#allocation1 + $0x38] sm:$0xff pattern:$0x73625140]  ;;  %248 = vmatmul.f32.vlgmr.msrb.gmra.mxu3 %v64_v9  ;;  %208 = vmatmul.f32.vlgmr.msrb.gmra.mxu1 %v62_v7 }
  0x2a   :  { %279 = vst [vmem:[#allocation1 + $0x20] ss:$4 sm:$0xff] %v50_v15  ;;  %v255_v7 = vld [vmem:[#allocation3] sm:$0x3] }
  0x2e   :  { %v282_v28 = vld.sshfl [vmem:[#allocation1 + $0x10] sm:$0xff pattern:$0x73625140]  ;;  %v280_v29 = vld.sshfl [vmem:[#allocation1] sm:$0xff pattern:$0x73625140] }
  0x2f   :  { %351 = vmatpush.xpose.msra.mxu2 %v282_v28  ;;  %311 = vmatpush.xpose.msra.mxu0 %v280_v29  ;;  %v283_v30 = vld.sshfl [vmem:[#allocation1 + $0x18] sm:$0xff pattern:$0x73625140]  ;;  %v281_v31 = vld.sshfl [vmem:[#allocation1 + $0x8] sm:$0xff pattern:$0x73625140] }
  0x30   :  { %371 = vmatpush.xpose.msra.mxu3 %v283_v30  ;;  %331 = vmatpush.xpose.msra.mxu1 %v281_v31 }
  0x31   :  { %v286_v32 = vld.sshfl [vmem:[#allocation1 + $0x30] sm:$0xff pattern:$0x73625140]  ;;  %v284_v33 = vld.sshfl [vmem:[#allocation1 + $0x20] sm:$0xff pattern:$0x73625140] }
  0x32   :  { %352 = vmatmul.f32.vlgmr.msra.gmra.mxu2 %v263_v22  ;;  %312 = vmatmul.f32.vlgmr.msra.gmra.mxu0 %v261_v20  ;;  %v287_v34 = vld.sshfl [vmem:[#allocation1 + $0x38] sm:$0xff pattern:$0x73625140]  ;;  %v285_v35 = vld.sshfl [vmem:[#allocation1 + $0x28] sm:$0xff pattern:$0x73625140] }
  0x33   :  { %372 = vmatmul.f32.vlgmr.msra.gmra.mxu3 %v264_v23  ;;  %332 = vmatmul.f32.vlgmr.msra.gmra.mxu1 %v262_v21 }
  0x34   :  { %431 = vmatpush.xpose.msrb.mxu2 %v286_v32  ;;  %391 = vmatpush.xpose.msrb.mxu0 %v284_v33 }
  0x35   :  { %451 = vmatpush.xpose.msrb.mxu3 %v287_v34  ;;  %411 = vmatpush.xpose.msrb.mxu1 %v285_v35 }
  0x3a   :  { %432 = vmatmul.f32.vlgmr.msrb.gmra.mxu2 %v267_v26  ;;  %392 = vmatmul.f32.vlgmr.msrb.gmra.mxu0 %v265_v24 }
  0x3b   :  { %452 = vmatmul.f32.vlgmr.msrb.gmra.mxu3 %v268_v27  ;;  %412 = vmatmul.f32.vlgmr.msrb.gmra.mxu1 %v266_v25 }
  0x9d   :  { %v109_v37 = vpop.f32.mrf.mxu0 }
  0x9e   :  { %v129_v38 = vpop.f32.mrf.mxu1 }
  0x9f   :  { %v130_v39 = vadd.f32 %v129_v38, %v109_v37 }
  0xa3   :  { %v149_v40 = vpop.f32.mrf.mxu2 }
  0xa4   :  { %v150_v41 = vadd.f32 %v149_v40, %v130_v39  ;;  %v169_v42 = vpop.f32.mrf.mxu3 }
  0xa5   :  { %v189_v43 = vpop.f32.mrf.mxu0 }
  0xa6   :  { %v170_v44 = vadd.f32 %v169_v42, %v150_v41  ;;  %v209_v45 = vpop.f32.mrf.mxu1 }
  0xa8   :  { %v190_v46 = vadd.f32 %v189_v43, %v170_v44 }
  0xaa   :  { %v210_v47 = vadd.f32 %v209_v45, %v190_v46 }
  0xab   :  { %v229_v48 = vpop.f32.mrf.mxu2 }
  0xac   :  { %v230_v49 = vadd.f32 %v229_v48, %v210_v47  ;;  %v249_v50 = vpop.f32.mrf.mxu3 }
  0xae   :  { %v250_v52 = vadd.f32 %v249_v50, %v230_v49 }
  0xaf   :  { %v313_v53 = vpop.f32.mrf.mxu0 }
  0xb0   :  { %v252_v54 = vadd.f32 %v250_v52, %v51_v51  ;;  %v333_v55 = vpop.f32.mrf.mxu1 }
  0xb1   :  { %v334_v56 = vadd.f32 %v333_v55, %v313_v53 }
  0xb2   :  { %254 = vst.msk [vmem:[#allocation2] sm:$0x3] %vm44_vm0, %v252_v54 }
  0xb5   :  { %v353_v57 = vpop.f32.mrf.mxu2 }
  0xb6   :  { %v354_v58 = vadd.f32 %v353_v57, %v334_v56  ;;  %v373_v59 = vpop.f32.mrf.mxu3 }
  0xb7   :  { %v393_v60 = vpop.f32.mrf.mxu0 }
  0xb8   :  { %v374_v61 = vadd.f32 %v373_v59, %v354_v58  ;;  %v413_v62 = vpop.f32.mrf.mxu1 }
  0xb9   :  { %v461_v63 = vld [vmem:[#allocation2] sm:$0x3] }
  0xba   :  { %v394_v0 = vadd.f32 %v393_v60, %v374_v61  ;;  %v463_v1 = vmul.f32 %v461_v63, %v461_v63 }
  0xbc   :  { %v414_v2 = vadd.f32 %v413_v62, %v394_v0  ;;  %v464_v3 = vsel %vm44_vm0, %v463_v1, 0.0 }
  0xbd   :  { %v433_v4 = vpop.f32.mrf.mxu2  ;;  %465 = vadd.xlane.f32.xlu0 %v464_v3 }
  0xbe   :  { %v434_v5 = vadd.f32 %v433_v4, %v414_v2  ;;  %v453_v6 = vpop.f32.mrf.mxu3 }
  0xc0   :  { %v454_v8 = vadd.f32 %v453_v6, %v434_v5 }
  0xc2   :  { %v456_v9 = vadd.f32 %v454_v8, %v255_v7 }
  0xc4   :  { %457 = vst.msk [vmem:[#allocation3] sm:$0x3] %vm44_vm0, %v456_v9 }
  0xcb   :  { %v462_v10 = vld [vmem:[#allocation3] sm:$0x3] }
  0xcc   :  { %v478_v11 = vmul.f32 %v462_v10, %v462_v10 }
  0xce   :  { %v479_v12 = vsel %vm44_vm0, %v478_v11, 0.0 }
  0xcf   :  { %480 = vadd.xlane.f32.xlu0 %v479_v12 }
 0x130   :  { %v466_v13 = vpop.xlane.xlu0 %465 }
 0x131   :  { %v467_v14 = vmax.f32 %v466_v13, 1e-24 }
 0x133   :  { %544 = vrsqrt.f32 %v467_v14  ;;  %vm474_vm2 = vweird.f32 %v467_v14 }
 0x139   :  { %v545_v15 = vpop.eup %544 }
 0x13a   :  { %v469_v16 = vmul.f32 %v545_v15, %v467_v14  ;;  %vm475_vm1 = vweird.f32 %v545_v15 }
 0x13b   :  { %vm476_vm4 = vmor %vm474_vm2, %vm475_vm1 }
 0x13c   :  { %v470_v19 = vmul.f32 %v545_v15, %v469_v16 }
 0x13e   :  { %v471_v20 = vmul.f32 0.5, %v470_v19 }
 0x140   :  { %v472_v22 = vsub.f32 1.5, %v471_v20 }
 0x142   :  { %v481_v17 = vpop.xlane.xlu0 %480  ;;  %v473_v26 = vmul.f32 %v545_v15, %v472_v22 }
 0x143   :  { %v482_v18 = vmax.f32 %v481_v17, 1e-24 }
 0x144   :  { %v477_v29 = vsel %vm476_vm4, %v545_v15, %v473_v26 }
 0x145   :  { %546 = vrsqrt.f32 %v482_v18  ;;  %vm489_vm5 = vweird.f32 %v482_v18  ;;  %v494_v32 = vmul.f32 %v477_v29, %v461_v63 }
 0x146   :  { %548 = vrcp.f32 %v619_v36 }
 0x14b   :  { %v547_v21 = vpop.eup %546 }
 0x14c   :  { %v484_v23 = vmul.f32 %v547_v21, %v482_v18  ;;  %vm490_vm3 = vweird.f32 %v547_v21  ;;  %v549_v37 = vpop.eup %548 }
 0x14d   :  { %vm491_vm6 = vmor %vm489_vm5, %vm490_vm3  ;;  %v508_v38 = vmul.f32 4.0, %v549_v37  ;;  %vm512_vm7 = vweird.f32 %v549_v37 }
 0x14e   :  { %v485_v24 = vmul.f32 %v547_v21, %v484_v23 }
 0x14f   :  { %v509_v39 = vsub.f32 1.0, %v508_v38 }
 0x150   :  { %v486_v25 = vmul.f32 0.5, %v485_v24 }
 0x151   :  { %v510_v43 = vmul.f32 %v549_v37, %v509_v39 }
 0x152   :  { %v487_v27 = vsub.f32 1.5, %v486_v25 }
 0x153   :  { %v511_v46 = vadd.f32 %v549_v37, %v510_v43 }
 0x154   :  { %v488_v28 = vmul.f32 %v547_v21, %v487_v27 }
 0x155   :  { %v513_v49 = vsel %vm512_vm7, %v549_v37, %v511_v46 }
 0x156   :  { %v492_v30 = vsel %vm491_vm6, %v547_v21, %v488_v28 }
 0x157   :  { %v493_v31 = vmul.f32 %v492_v30, %v462_v10 }
 0x159   :  { %v495_v33 = vsub.f32 %v493_v31, %v494_v32 }
 0x15b   :  { %v496_v34 = vmul.f32 %v495_v33, %v495_v33 }
 0x15d   :  { %v497_v35 = vsel %vm44_vm0, %v496_v34, 0.0 }
 0x15e   :  { %498 = vadd.xlane.f32.xlu1 %v497_v35 }
 0x1d1   :  { %v499_v40 = vpop.xlane.xlu1 %498 }
 0x1d2   :  { %v500_v41 = vrot.slane %v499_v40, 4 }
 0x1d4   :  { %v501_v42 = vadd.f32 %v500_v41, %v499_v40 }
 0x1d6   :  { %v502_v44 = vrot.slane %v501_v42, 2 }
 0x1d8   :  { %v503_v45 = vadd.f32 %v502_v44, %v501_v42 }
 0x1da   :  { %v504_v47 = vrot.slane %v503_v45, 1 }
 0x1dc   :  { %v505_v48 = vadd.f32 %v504_v47, %v503_v45 }
 0x1de   :  { %535 = vpush %v505_v48 }
 0x1df   :  { %537 = vpush %v513_v49 }
 0x20f   :  { %s536_s20 = spop %535 }
 0x210   :  { %s538_s21 = spop %537 }
 0x211   :  { %s515_s22 = smul.f32 %s538_s21, %s536_s20 }
 0x213   :  { %517 = sst [smem:[#allocation9]] %s515_s22 }
 0x214   :  { %526 = dma.smem_to_hbm %s620_s23, 16, %s524_s19, [#allocation6]  }
 0x215   :  { %614 = dma.done.wait [#allocation6], 16  }
 0x216   :  { %615 = vsyncadd [#allocation6], 4294967280 }
 0x217   :  { %531 = sfence }
 0x218   :  { %532 = vsyncpa [#allocation5], 1 }
 0x219   :  { %533 = vsyncpa [#allocation8], 1 }
 0x21a   :  { %534 = vsyncpa [#allocation6], 1 }

</bundles_post_ra>
